<compile_context>
chip_gen: v7x
topology: tpu7x:2x2x1
jax: 0.10.0
libtpu: 0.0.40
codegen_flags: <defaults>
</compile_context>

<pallas_src>
import functools

import jax
import jax.numpy as jnp
from jax import lax
from jax.experimental import pallas as pl
from jax.experimental.pallas import tpu as pltpu


def _make_rb2o_kernel(H, W):
    """Builds the fused RB2O forward kernel for an (H, W) init_recon tile."""
    HO, WO = H - 2, W - 2          # spatial size after a 3x3 "valid" conv

    def kernel(x_ref, cs_ref, ws_ref, bs_ref, wc1_ref, bc1_ref,
               ws2_ref, bs2_ref, wi_ref, bi_ref, out_ref):
        # x_ref  : (B, H*W)  init_recon; batch in sublanes, spatial in lanes
        # cs_ref : (B, nc)   compressed measurements
        # ws_ref : (9, nc)   samping weights, tap-major (dh*3+dw), channel in lanes
        # ws2_ref: (9, nc)   samping_2 weights, same layout
        # wc1_ref: (1, nc)   conv1 (1x1) weights
        # wi_ref : (1, nc)   init  (1x1) weights
        # b*_ref : (1, nc) / (1, 1) biases
        # out_ref: (B, H*W)  result
        x = x_ref[...]
        ws = ws_ref[...]
        bs = bs_ref[...]
        wc1 = wc1_ref[...]
        bc1 = bc1_ref[...]
        ws2 = ws2_ref[...]
        bs2 = bs2_ref[...]
        wi = wi_ref[...]
        bi = bi_ref[...]

        # ---- samping (3x3 valid conv, 1 -> nc) fused with conv1 (1x1, nc -> 1)
        # For each of the HO*WO output positions: one im2col matmul
        # (B, 9) @ (9, nc), then a VPU multiply + lane-reduce for the 1x1 conv.
        pred_cols = []
        for i in range(HO):
            for j in range(WO):
                patch = jnp.concatenate(
                    [x[:, (i + dh) * W + j:(i + dh) * W + j + 3]
                     for dh in range(3)], axis=1)                          # (B, 9)
                sampe_ij = jnp.dot(patch, ws,
                                   preferred_element_type=jnp.float32) + bs  # (B, nc)
                pred_ij = jnp.sum(sampe_ij * wc1, axis=1,
                                  keepdims=True) + bc1                     # (B, 1)
                pred_cols.append(pred_ij)
        prediction_img = jnp.concatenate(pred_cols, axis=1)                # (B, HO*WO) = (B, 9)

        # ---- samping_2 (3x3 valid conv on the 3x3 prediction -> 1x1, 1 -> nc)
        prediction_img_cs = jnp.dot(prediction_img, ws2,
                                    preferred_element_type=jnp.float32) + bs2  # (B, nc)

        # ---- residual in measurement space
        residual_cs = cs_ref[...] - prediction_img_cs                      # (B, nc)

        # ---- init (1x1 conv, nc -> 1): VPU multiply + lane-reduce
        init_res = jnp.sum(residual_cs * wi, axis=1, keepdims=True) + bi   # (B, 1)

        # ---- result = init_res + init_recon (broadcast over the spatial lanes)
        out_ref[...] = x + init_res

    return kernel


def rb2o_forward(init_recon, cs, w_s, b_s, w_c1, b_c1, w_s2, b_s2, w_i, b_i):
    """Fused Pallas forward of RB2O (blocksize=1 configuration).

    init_recon: (B, 1, H, W) f32, H = W = 5
    cs        : (B, nc, 1, 1) f32
    w_s/w_s2  : (nc, 1, 3, 3) OIHW,  b_s/b_s2: (nc,)
    w_c1/w_i  : (1, nc, 1, 1) OIHW,  b_c1/b_i: (1,)
    returns   : (B, 1, H, W) f32
    """
    B, cin, H, W = init_recon.shape
    nc = w_s.shape[0]
    assert cin == 1, "samping expects a single-channel init_recon"
    assert w_c1.shape == (1, nc, 1, 1) and w_i.shape == (1, nc, 1, 1), (
        "kernel targets blocksize == 1 (the only configuration for which the "
        "module's forward is shape-consistent)")
    assert (H - 2, W - 2) == (3, 3), (
        "init_recon must be 5x5 so init_res is 1x1 and the final "
        "`init_res + init_recon` broadcast is valid")
    assert cs.shape == (B, nc, 1, 1)

    f32 = jnp.float32
    # Wrapper-side layout plumbing only (never done inside the kernel):
    x_flat = init_recon.reshape(B, H * W).astype(f32)
    cs_flat = cs.reshape(B, nc).astype(f32)
    ws_t = w_s.reshape(nc, 9).T.astype(f32)        # (9, nc), tap dh*3+dw major
    ws2_t = w_s2.reshape(nc, 9).T.astype(f32)      # (9, nc)
    wc1_row = w_c1.reshape(1, nc).astype(f32)      # (1, nc)
    wi_row = w_i.reshape(1, nc).astype(f32)        # (1, nc)
    bs_r = b_s.reshape(1, nc).astype(f32)
    bs2_r = b_s2.reshape(1, nc).astype(f32)
    bc1_r = b_c1.reshape(1, 1).astype(f32)
    bi_r = b_i.reshape(1, 1).astype(f32)

    vmem = pl.BlockSpec(memory_space=pltpu.MemorySpace.VMEM)
    out_flat = pl.pallas_call(
        _make_rb2o_kernel(H, W),
        out_shape=jax.ShapeDtypeStruct((B, H * W), f32),
        in_specs=[vmem] * 10,
        out_specs=vmem,
    )(x_flat, cs_flat, ws_t, bs_r, wc1_row, bc1_r, ws2_t, bs2_r, wi_row, bi_r)
    return out_flat.reshape(B, 1, H, W)


def rb2o_reference(init_recon, cs, w_s, b_s, w_c1, b_c1, w_s2, b_s2, w_i, b_i,
                   blocksize):
    """Plain-JAX reference mirroring the PyTorch NCHW forward exactly."""
    dn = ("NCHW", "OIHW", "NCHW")
    conv = functools.partial(lax.conv_general_dilated, padding="VALID",
                             dimension_numbers=dn,
                             precision=lax.Precision.HIGHEST)
    sampe_cs = conv(init_recon, w_s, window_strides=(1, 1)) \
        + b_s[None, :, None, None]
    prediction_img = conv(sampe_cs, w_c1,
                          window_strides=(blocksize, blocksize)) \
        + b_c1[None, :, None, None]
    prediction_img_cs = conv(prediction_img, w_s2, window_strides=(1, 1)) \
        + b_s2[None, :, None, None]
    residual_cs = cs - prediction_img_cs
    init_res = conv(residual_cs, w_i, window_strides=(1, 1)) \
        + b_i[None, :, None, None]
    return init_res + init_recon


if __name__ == "__main__":
    # Constructor params chosen so the as-written forward is shape-consistent
    # (see NOTE at top of file).
    blocksize = 1
    subrate = 4.0
    nc = int(round(blocksize * blocksize * subrate))   # 4 measurement channels
    B, H, W = 2, 5, 5

    key = jax.random.PRNGKey(0)
    ks = jax.random.split(key, 10)
    init_recon = jax.random.normal(ks[0], (B, 1, H, W), jnp.float32)
    cs = jax.random.normal(ks[1], (B, nc, 1, 1), jnp.float32)
    w_s = jax.random.normal(ks[2], (nc, 1, 3, 3), jnp.float32) * 0.2
    b_s = jax.random.normal(ks[3], (nc,), jnp.float32) * 0.1
    w_c1 = jax.random.normal(
        ks[4], (blocksize * blocksize, nc, blocksize, blocksize), jnp.float32) * 0.2
    b_c1 = jax.random.normal(ks[5], (blocksize * blocksize,), jnp.float32) * 0.1
    w_s2 = jax.random.normal(ks[6], (nc, 1, 3, 3), jnp.float32) * 0.2
    b_s2 = jax.random.normal(ks[7], (nc,), jnp.float32) * 0.1
    w_i = jax.random.normal(
        ks[8], (blocksize * blocksize, nc, blocksize, blocksize), jnp.float32) * 0.2
    b_i = jax.random.normal(ks[9], (blocksize * blocksize,), jnp.float32) * 0.1

    out = rb2o_forward(init_recon, cs, w_s, b_s, w_c1, b_c1,
                       w_s2, b_s2, w_i, b_i)
    jax.block_until_ready(out)

    expected = rb2o_reference(init_recon, cs, w_s, b_s, w_c1, b_c1,
                              w_s2, b_s2, w_i, b_i, blocksize)
    assert out.shape == expected.shape, (out.shape, expected.shape)
    assert jnp.allclose(out, expected, atol=1e-4, rtol=1e-4), \
        "mismatch vs reference"
    print("KERNEL_OK")
</pallas_src>

<mosaic_0001>
module attributes {stable_mosaic.version = 11 : i64} {
  func.func @kernel(%arg0: memref<2x25xf32, #tpu.memory_space<vmem>>, %arg1: memref<2x4xf32, #tpu.memory_space<vmem>>, %arg2: memref<9x4xf32, #tpu.memory_space<vmem>>, %arg3: memref<1x4xf32, #tpu.memory_space<vmem>>, %arg4: memref<1x4xf32, #tpu.memory_space<vmem>>, %arg5: memref<1x1xf32, #tpu.memory_space<vmem>>, %arg6: memref<9x4xf32, #tpu.memory_space<vmem>>, %arg7: memref<1x4xf32, #tpu.memory_space<vmem>>, %arg8: memref<1x4xf32, #tpu.memory_space<vmem>>, %arg9: memref<1x1xf32, #tpu.memory_space<vmem>>, %arg10: memref<2x25xf32, #tpu.memory_space<vmem>>) attributes {dimension_semantics = [], scalar_prefetch = 0 : i64, scratch_operands = 0 : i64, tpu.core_type = #tpu.core_type<tc>} {
    %c0 = arith.constant 0 : index
    %c0_0 = arith.constant 0 : index
    %0 = vector.load %arg0[%c0, %c0_0] : memref<2x25xf32, #tpu.memory_space<vmem>>, vector<2x25xf32>
    %c0_1 = arith.constant 0 : index
    %c0_2 = arith.constant 0 : index
    %1 = vector.load %arg2[%c0_1, %c0_2] : memref<9x4xf32, #tpu.memory_space<vmem>>, vector<9x4xf32>
    %c0_3 = arith.constant 0 : index
    %c0_4 = arith.constant 0 : index
    %2 = vector.load %arg3[%c0_3, %c0_4] : memref<1x4xf32, #tpu.memory_space<vmem>>, vector<1x4xf32>
    %c0_5 = arith.constant 0 : index
    %c0_6 = arith.constant 0 : index
    %3 = vector.load %arg4[%c0_5, %c0_6] : memref<1x4xf32, #tpu.memory_space<vmem>>, vector<1x4xf32>
    %c0_7 = arith.constant 0 : index
    %c0_8 = arith.constant 0 : index
    %4 = vector.load %arg5[%c0_7, %c0_8] : memref<1x1xf32, #tpu.memory_space<vmem>>, vector<1x1xf32>
    %c0_9 = arith.constant 0 : index
    %c0_10 = arith.constant 0 : index
    %5 = vector.load %arg6[%c0_9, %c0_10] : memref<9x4xf32, #tpu.memory_space<vmem>>, vector<9x4xf32>
    %c0_11 = arith.constant 0 : index
    %c0_12 = arith.constant 0 : index
    %6 = vector.load %arg7[%c0_11, %c0_12] : memref<1x4xf32, #tpu.memory_space<vmem>>, vector<1x4xf32>
    %c0_13 = arith.constant 0 : index
    %c0_14 = arith.constant 0 : index
    %7 = vector.load %arg8[%c0_13, %c0_14] : memref<1x4xf32, #tpu.memory_space<vmem>>, vector<1x4xf32>
    %c0_15 = arith.constant 0 : index
    %c0_16 = arith.constant 0 : index
    %8 = vector.load %arg9[%c0_15, %c0_16] : memref<1x1xf32, #tpu.memory_space<vmem>>, vector<1x1xf32>
    %9 = vector.extract_strided_slice %0 {offsets = [0, 0], sizes = [2, 3], strides = [1, 1]} : vector<2x25xf32> to vector<2x3xf32>
    %10 = vector.extract_strided_slice %0 {offsets = [0, 5], sizes = [2, 3], strides = [1, 1]} : vector<2x25xf32> to vector<2x3xf32>
    %11 = vector.extract_strided_slice %0 {offsets = [0, 10], sizes = [2, 3], strides = [1, 1]} : vector<2x25xf32> to vector<2x3xf32>
    %12 = tpu.concatenate %9, %10, %11 in 1 : vector<2x3xf32>, vector<2x3xf32>, vector<2x3xf32> -> vector<2x9xf32>
    %cst = arith.constant dense<0.000000e+00> : vector<2x4xf32>
    %13 = tpu.matmul %12, %1, %cst {dimension_numbers = #tpu.dot_dimension_numbers<[1], [0], [0], [1], [0, 0, 1, 1], [], []>} : vector<2x9xf32>, vector<9x4xf32>, vector<2x4xf32> -> vector<2x4xf32>
    %14 = vector.broadcast %2 : vector<1x4xf32> to vector<2x4xf32>
    %15 = arith.addf %13, %14 : vector<2x4xf32>
    %16 = vector.broadcast %3 : vector<1x4xf32> to vector<2x4xf32>
    %17 = arith.mulf %15, %16 : vector<2x4xf32>
    %cst_17 = arith.constant dense<0.000000e+00> : vector<2xf32>
    %18 = vector.multi_reduction <add>, %17, %cst_17 [1] : vector<2x4xf32> to vector<2xf32>
    %19 = vector.shape_cast %18 : vector<2xf32> to vector<2x1xf32>
    %20 = vector.broadcast %4 : vector<1x1xf32> to vector<2x1xf32>
    %21 = arith.addf %19, %20 : vector<2x1xf32>
    %22 = vector.extract_strided_slice %0 {offsets = [0, 1], sizes = [2, 3], strides = [1, 1]} : vector<2x25xf32> to vector<2x3xf32>
    %23 = vector.extract_strided_slice %0 {offsets = [0, 6], sizes = [2, 3], strides = [1, 1]} : vector<2x25xf32> to vector<2x3xf32>
    %24 = vector.extract_strided_slice %0 {offsets = [0, 11], sizes = [2, 3], strides = [1, 1]} : vector<2x25xf32> to vector<2x3xf32>
    %25 = tpu.concatenate %22, %23, %24 in 1 : vector<2x3xf32>, vector<2x3xf32>, vector<2x3xf32> -> vector<2x9xf32>
    %cst_18 = arith.constant dense<0.000000e+00> : vector<2x4xf32>
    %26 = tpu.matmul %25, %1, %cst_18 {dimension_numbers = #tpu.dot_dimension_numbers<[1], [0], [0], [1], [0, 0, 1, 1], [], []>} : vector<2x9xf32>, vector<9x4xf32>, vector<2x4xf32> -> vector<2x4xf32>
    %27 = vector.broadcast %2 : vector<1x4xf32> to vector<2x4xf32>
    %28 = arith.addf %26, %27 : vector<2x4xf32>
    %29 = vector.broadcast %3 : vector<1x4xf32> to vector<2x4xf32>
    %30 = arith.mulf %28, %29 : vector<2x4xf32>
    %cst_19 = arith.constant dense<0.000000e+00> : vector<2xf32>
    %31 = vector.multi_reduction <add>, %30, %cst_19 [1] : vector<2x4xf32> to vector<2xf32>
    %32 = vector.shape_cast %31 : vector<2xf32> to vector<2x1xf32>
    %33 = vector.broadcast %4 : vector<1x1xf32> to vector<2x1xf32>
    %34 = arith.addf %32, %33 : vector<2x1xf32>
    %35 = vector.extract_strided_slice %0 {offsets = [0, 2], sizes = [2, 3], strides = [1, 1]} : vector<2x25xf32> to vector<2x3xf32>
    %36 = vector.extract_strided_slice %0 {offsets = [0, 7], sizes = [2, 3], strides = [1, 1]} : vector<2x25xf32> to vector<2x3xf32>
    %37 = vector.extract_strided_slice %0 {offsets = [0, 12], sizes = [2, 3], strides = [1, 1]} : vector<2x25xf32> to vector<2x3xf32>
    %38 = tpu.concatenate %35, %36, %37 in 1 : vector<2x3xf32>, vector<2x3xf32>, vector<2x3xf32> -> vector<2x9xf32>
    %cst_20 = arith.constant dense<0.000000e+00> : vector<2x4xf32>
    %39 = tpu.matmul %38, %1, %cst_20 {dimension_numbers = #tpu.dot_dimension_numbers<[1], [0], [0], [1], [0, 0, 1, 1], [], []>} : vector<2x9xf32>, vector<9x4xf32>, vector<2x4xf32> -> vector<2x4xf32>
    %40 = vector.broadcast %2 : vector<1x4xf32> to vector<2x4xf32>
    %41 = arith.addf %39, %40 : vector<2x4xf32>
    %42 = vector.broadcast %3 : vector<1x4xf32> to vector<2x4xf32>
    %43 = arith.mulf %41, %42 : vector<2x4xf32>
    %cst_21 = arith.constant dense<0.000000e+00> : vector<2xf32>
    %44 = vector.multi_reduction <add>, %43, %cst_21 [1] : vector<2x4xf32> to vector<2xf32>
    %45 = vector.shape_cast %44 : vector<2xf32> to vector<2x1xf32>
    %46 = vector.broadcast %4 : vector<1x1xf32> to vector<2x1xf32>
    %47 = arith.addf %45, %46 : vector<2x1xf32>
    %48 = vector.extract_strided_slice %0 {offsets = [0, 5], sizes = [2, 3], strides = [1, 1]} : vector<2x25xf32> to vector<2x3xf32>
    %49 = vector.extract_strided_slice %0 {offsets = [0, 10], sizes = [2, 3], strides = [1, 1]} : vector<2x25xf32> to vector<2x3xf32>
    %50 = vector.extract_strided_slice %0 {offsets = [0, 15], sizes = [2, 3], strides = [1, 1]} : vector<2x25xf32> to vector<2x3xf32>
    %51 = tpu.concatenate %48, %49, %50 in 1 : vector<2x3xf32>, vector<2x3xf32>, vector<2x3xf32> -> vector<2x9xf32>
    %cst_22 = arith.constant dense<0.000000e+00> : vector<2x4xf32>
    %52 = tpu.matmul %51, %1, %cst_22 {dimension_numbers = #tpu.dot_dimension_numbers<[1], [0], [0], [1], [0, 0, 1, 1], [], []>} : vector<2x9xf32>, vector<9x4xf32>, vector<2x4xf32> -> vector<2x4xf32>
    %53 = vector.broadcast %2 : vector<1x4xf32> to vector<2x4xf32>
    %54 = arith.addf %52, %53 : vector<2x4xf32>
    %55 = vector.broadcast %3 : vector<1x4xf32> to vector<2x4xf32>
    %56 = arith.mulf %54, %55 : vector<2x4xf32>
    %cst_23 = arith.constant dense<0.000000e+00> : vector<2xf32>
    %57 = vector.multi_reduction <add>, %56, %cst_23 [1] : vector<2x4xf32> to vector<2xf32>
    %58 = vector.shape_cast %57 : vector<2xf32> to vector<2x1xf32>
    %59 = vector.broadcast %4 : vector<1x1xf32> to vector<2x1xf32>
    %60 = arith.addf %58, %59 : vector<2x1xf32>
    %61 = vector.extract_strided_slice %0 {offsets = [0, 6], sizes = [2, 3], strides = [1, 1]} : vector<2x25xf32> to vector<2x3xf32>
    %62 = vector.extract_strided_slice %0 {offsets = [0, 11], sizes = [2, 3], strides = [1, 1]} : vector<2x25xf32> to vector<2x3xf32>
    %63 = vector.extract_strided_slice %0 {offsets = [0, 16], sizes = [2, 3], strides = [1, 1]} : vector<2x25xf32> to vector<2x3xf32>
    %64 = tpu.concatenate %61, %62, %63 in 1 : vector<2x3xf32>, vector<2x3xf32>, vector<2x3xf32> -> vector<2x9xf32>
    %cst_24 = arith.constant dense<0.000000e+00> : vector<2x4xf32>
    %65 = tpu.matmul %64, %1, %cst_24 {dimension_numbers = #tpu.dot_dimension_numbers<[1], [0], [0], [1], [0, 0, 1, 1], [], []>} : vector<2x9xf32>, vector<9x4xf32>, vector<2x4xf32> -> vector<2x4xf32>
    %66 = vector.broadcast %2 : vector<1x4xf32> to vector<2x4xf32>
    %67 = arith.addf %65, %66 : vector<2x4xf32>
    %68 = vector.broadcast %3 : vector<1x4xf32> to vector<2x4xf32>
    %69 = arith.mulf %67, %68 : vector<2x4xf32>
    %cst_25 = arith.constant dense<0.000000e+00> : vector<2xf32>
    %70 = vector.multi_reduction <add>, %69, %cst_25 [1] : vector<2x4xf32> to vector<2xf32>
    %71 = vector.shape_cast %70 : vector<2xf32> to vector<2x1xf32>
    %72 = vector.broadcast %4 : vector<1x1xf32> to vector<2x1xf32>
    %73 = arith.addf %71, %72 : vector<2x1xf32>
    %74 = vector.extract_strided_slice %0 {offsets = [0, 7], sizes = [2, 3], strides = [1, 1]} : vector<2x25xf32> to vector<2x3xf32>
    %75 = vector.extract_strided_slice %0 {offsets = [0, 12], sizes = [2, 3], strides = [1, 1]} : vector<2x25xf32> to vector<2x3xf32>
    %76 = vector.extract_strided_slice %0 {offsets = [0, 17], sizes = [2, 3], strides = [1, 1]} : vector<2x25xf32> to vector<2x3xf32>
    %77 = tpu.concatenate %74, %75, %76 in 1 : vector<2x3xf32>, vector<2x3xf32>, vector<2x3xf32> -> vector<2x9xf32>
    %cst_26 = arith.constant dense<0.000000e+00> : vector<2x4xf32>
    %78 = tpu.matmul %77, %1, %cst_26 {dimension_numbers = #tpu.dot_dimension_numbers<[1], [0], [0], [1], [0, 0, 1, 1], [], []>} : vector<2x9xf32>, vector<9x4xf32>, vector<2x4xf32> -> vector<2x4xf32>
    %79 = vector.broadcast %2 : vector<1x4xf32> to vector<2x4xf32>
    %80 = arith.addf %78, %79 : vector<2x4xf32>
    %81 = vector.broadcast %3 : vector<1x4xf32> to vector<2x4xf32>
    %82 = arith.mulf %80, %81 : vector<2x4xf32>
    %cst_27 = arith.constant dense<0.000000e+00> : vector<2xf32>
    %83 = vector.multi_reduction <add>, %82, %cst_27 [1] : vector<2x4xf32> to vector<2xf32>
    %84 = vector.shape_cast %83 : vector<2xf32> to vector<2x1xf32>
    %85 = vector.broadcast %4 : vector<1x1xf32> to vector<2x1xf32>
    %86 = arith.addf %84, %85 : vector<2x1xf32>
    %87 = vector.extract_strided_slice %0 {offsets = [0, 10], sizes = [2, 3], strides = [1, 1]} : vector<2x25xf32> to vector<2x3xf32>
    %88 = vector.extract_strided_slice %0 {offsets = [0, 15], sizes = [2, 3], strides = [1, 1]} : vector<2x25xf32> to vector<2x3xf32>
    %89 = vector.extract_strided_slice %0 {offsets = [0, 20], sizes = [2, 3], strides = [1, 1]} : vector<2x25xf32> to vector<2x3xf32>
    %90 = tpu.concatenate %87, %88, %89 in 1 : vector<2x3xf32>, vector<2x3xf32>, vector<2x3xf32> -> vector<2x9xf32>
    %cst_28 = arith.constant dense<0.000000e+00> : vector<2x4xf32>
    %91 = tpu.matmul %90, %1, %cst_28 {dimension_numbers = #tpu.dot_dimension_numbers<[1], [0], [0], [1], [0, 0, 1, 1], [], []>} : vector<2x9xf32>, vector<9x4xf32>, vector<2x4xf32> -> vector<2x4xf32>
    %92 = vector.broadcast %2 : vector<1x4xf32> to vector<2x4xf32>
    %93 = arith.addf %91, %92 : vector<2x4xf32>
    %94 = vector.broadcast %3 : vector<1x4xf32> to vector<2x4xf32>
    %95 = arith.mulf %93, %94 : vector<2x4xf32>
    %cst_29 = arith.constant dense<0.000000e+00> : vector<2xf32>
    %96 = vector.multi_reduction <add>, %95, %cst_29 [1] : vector<2x4xf32> to vector<2xf32>
    %97 = vector.shape_cast %96 : vector<2xf32> to vector<2x1xf32>
    %98 = vector.broadcast %4 : vector<1x1xf32> to vector<2x1xf32>
    %99 = arith.addf %97, %98 : vector<2x1xf32>
    %100 = vector.extract_strided_slice %0 {offsets = [0, 11], sizes = [2, 3], strides = [1, 1]} : vector<2x25xf32> to vector<2x3xf32>
    %101 = vector.extract_strided_slice %0 {offsets = [0, 16], sizes = [2, 3], strides = [1, 1]} : vector<2x25xf32> to vector<2x3xf32>
    %102 = vector.extract_strided_slice %0 {offsets = [0, 21], sizes = [2, 3], strides = [1, 1]} : vector<2x25xf32> to vector<2x3xf32>
    %103 = tpu.concatenate %100, %101, %102 in 1 : vector<2x3xf32>, vector<2x3xf32>, vector<2x3xf32> -> vector<2x9xf32>
    %cst_30 = arith.constant dense<0.000000e+00> : vector<2x4xf32>
    %104 = tpu.matmul %103, %1, %cst_30 {dimension_numbers = #tpu.dot_dimension_numbers<[1], [0], [0], [1], [0, 0, 1, 1], [], []>} : vector<2x9xf32>, vector<9x4xf32>, vector<2x4xf32> -> vector<2x4xf32>
    %105 = vector.broadcast %2 : vector<1x4xf32> to vector<2x4xf32>
    %106 = arith.addf %104, %105 : vector<2x4xf32>
    %107 = vector.broadcast %3 : vector<1x4xf32> to vector<2x4xf32>
    %108 = arith.mulf %106, %107 : vector<2x4xf32>
    %cst_31 = arith.constant dense<0.000000e+00> : vector<2xf32>
    %109 = vector.multi_reduction <add>, %108, %cst_31 [1] : vector<2x4xf32> to vector<2xf32>
    %110 = vector.shape_cast %109 : vector<2xf32> to vector<2x1xf32>
    %111 = vector.broadcast %4 : vector<1x1xf32> to vector<2x1xf32>
    %112 = arith.addf %110, %111 : vector<2x1xf32>
    %113 = vector.extract_strided_slice %0 {offsets = [0, 12], sizes = [2, 3], strides = [1, 1]} : vector<2x25xf32> to vector<2x3xf32>
    %114 = vector.extract_strided_slice %0 {offsets = [0, 17], sizes = [2, 3], strides = [1, 1]} : vector<2x25xf32> to vector<2x3xf32>
    %115 = vector.extract_strided_slice %0 {offsets = [0, 22], sizes = [2, 3], strides = [1, 1]} : vector<2x25xf32> to vector<2x3xf32>
    %116 = tpu.concatenate %113, %114, %115 in 1 : vector<2x3xf32>, vector<2x3xf32>, vector<2x3xf32> -> vector<2x9xf32>
    %cst_32 = arith.constant dense<0.000000e+00> : vector<2x4xf32>
    %117 = tpu.matmul %116, %1, %cst_32 {dimension_numbers = #tpu.dot_dimension_numbers<[1], [0], [0], [1], [0, 0, 1, 1], [], []>} : vector<2x9xf32>, vector<9x4xf32>, vector<2x4xf32> -> vector<2x4xf32>
    %118 = vector.broadcast %2 : vector<1x4xf32> to vector<2x4xf32>
    %119 = arith.addf %117, %118 : vector<2x4xf32>
    %120 = vector.broadcast %3 : vector<1x4xf32> to vector<2x4xf32>
    %121 = arith.mulf %119, %120 : vector<2x4xf32>
    %cst_33 = arith.constant dense<0.000000e+00> : vector<2xf32>
    %122 = vector.multi_reduction <add>, %121, %cst_33 [1] : vector<2x4xf32> to vector<2xf32>
    %123 = vector.shape_cast %122 : vector<2xf32> to vector<2x1xf32>
    %124 = vector.broadcast %4 : vector<1x1xf32> to vector<2x1xf32>
    %125 = arith.addf %123, %124 : vector<2x1xf32>
    %126 = tpu.concatenate %21, %34, %47, %60, %73, %86, %99, %112, %125 in 1 : vector<2x1xf32>, vector<2x1xf32>, vector<2x1xf32>, vector<2x1xf32>, vector<2x1xf32>, vector<2x1xf32>, vector<2x1xf32>, vector<2x1xf32>, vector<2x1xf32> -> vector<2x9xf32>
    %cst_34 = arith.constant dense<0.000000e+00> : vector<2x4xf32>
    %127 = tpu.matmul %126, %5, %cst_34 {dimension_numbers = #tpu.dot_dimension_numbers<[1], [0], [0], [1], [0, 0, 1, 1], [], []>} : vector<2x9xf32>, vector<9x4xf32>, vector<2x4xf32> -> vector<2x4xf32>
    %128 = vector.broadcast %6 : vector<1x4xf32> to vector<2x4xf32>
    %129 = arith.addf %127, %128 : vector<2x4xf32>
    %c0_35 = arith.constant 0 : index
    %c0_36 = arith.constant 0 : index
    %130 = vector.load %arg1[%c0_35, %c0_36] : memref<2x4xf32, #tpu.memory_space<vmem>>, vector<2x4xf32>
    %131 = arith.subf %130, %129 : vector<2x4xf32>
    %132 = vector.broadcast %7 : vector<1x4xf32> to vector<2x4xf32>
    %133 = arith.mulf %131, %132 : vector<2x4xf32>
    %cst_37 = arith.constant dense<0.000000e+00> : vector<2xf32>
    %134 = vector.multi_reduction <add>, %133, %cst_37 [1] : vector<2x4xf32> to vector<2xf32>
    %135 = vector.shape_cast %134 : vector<2xf32> to vector<2x1xf32>
    %136 = vector.broadcast %8 : vector<1x1xf32> to vector<2x1xf32>
    %137 = arith.addf %135, %136 : vector<2x1xf32>
    %138 = vector.broadcast %137 : vector<2x1xf32> to vector<2x25xf32>
    %139 = arith.addf %0, %138 : vector<2x25xf32>
    %c0_38 = arith.constant 0 : index
    %c0_39 = arith.constant 0 : index
    %140 = vector.load %arg10[%c0_38, %c0_39] : memref<2x25xf32, #tpu.memory_space<vmem>>, vector<2x25xf32>
    tpu.vector_store %arg10[%c0_38, %c0_39], %139 {strides = array<i32>} : memref<2x25xf32, #tpu.memory_space<vmem>>, vector<2x25xf32>,
    return
  }
}

</mosaic_0001>

<bundles_post_ra>
// kernel: tpu_custom_call.1
= control target key start
LH: loop header
LB: loop body
LE: loop exit
PB: predicated region body
PF: predicated region fallthrough
CT: control target
= control target key end

     0   :  { %s1494_s0 = inlined_call_operand.vmem [shape: f32[2,25], index: 0, kind: input, shape index: {}]   ;;  %s1495_s1 = inlined_call_operand.vmem [shape: f32[2,4], index: 1, kind: input, shape index: {}]   ;;  %s1496_s2 = inlined_call_operand.vmem [shape: f32[9,4], index: 2, kind: input, shape index: {}]   ;;  %s1497_s3 = inlined_call_operand.vmem [shape: f32[1,4], index: 3, kind: input, shape index: {}]   ;;  %s1498_s4 = inlined_call_operand.vmem [shape: f32[1,4], index: 4, kind: input, shape index: {}]   ;;  %s1499_s5 = inlined_call_operand.<no memory space> [shape: f32[1,1], index: 5, kind: input, shape index: {}]   ;;  %s1500_s6 = inlined_call_operand.vmem [shape: f32[9,4], index: 6, kind: input, shape index: {}]   ;;  %s1501_s7 = inlined_call_operand.vmem [shape: f32[1,4], index: 7, kind: input, shape index: {}]   ;;  %s1502_s8 = inlined_call_operand.vmem [shape: f32[1,4], index: 8, kind: input, shape index: {}]   ;;  %s1503_s10 = inlined_call_operand.hbm [shape: f32[2,25], index: 10, kind: output, shape index: {}]   ;;  %s1504_s9 = inlined_call_operand.<no memory space> [shape: f32[1,1], index: 9, kind: input, shape index: {}]  }
   0x1   :  { %v15_v0 = vstv %s1499_s5  ;;  %v17_v1 = vstv %s1504_s9 }
   0x2   :  { %16 = vst [vmem:[#allocation2] sm:$0x1] %v15_v0  ;;  %18 = vst [vmem:[#allocation3] sm:$0x1] %v17_v1 }
   0x3   :  { %v1330_v2 = vld [vmem:[%s1494_s0] sm:$0x3]  ;;  %s1236_s19 = smov 127   ;;  %s1237_s20 = smov 126   ;;  %v42_v4 = vld [vmem:[%s1496_s2 + $0x8] sm:$0x1] }
   0x4   :  { %164 = vrot.lane.b32.xlu1 %v1330_v2, %s1236_s19  ;;  %52 = vrot.lane.b32.xlu0 %v1330_v2, %s1237_s20  ;;  %v41_v3 = vld [vmem:[%s1496_s2] sm:$0xff]  ;;  %vm72_vm0 = vcmask 1040384   ;;  %v1238_v5 = vmov 0.0|0.0   ;;  %vm1239_vm1 = vmmov 1   ;;  %vm1240_vm3 = vmmov 0  }
   0x5   :  { %1141 = vmatprep.subr.bf16.mxu0 %v1238_v5  ;;  %v1341_v6 = vpack.c.bf16 %v42_v4, %v41_v3  ;;  %1145 = vmatprep.subr.bf16.mxu1 %v1238_v5  ;;  %vm1344_vm2 = vmpackc.low %vm72_vm0, %vm1239_vm1  ;;  %v1241_v8 = vmov 0.0  }
   0x6   :  { %1075 = vmatprep.mubr.msk.f32.mxu0 %vm1240_vm3, %v1241_v8 }
   0x7   :  { %1144 = vmatpush3.bf16.msk.msra.mxu0 %vm1344_vm2, %v1341_v6 }
   0x8   :  { %19 = vsyncpa [#allocation5], 0  ;;  %s1242_s0 = smov 125   ;;  %s1243_s2 = smov 124   ;;  %1149 = vmatprep.subr.bf16.mxu0 %v1238_v5  ;;  %1148 = vmatpush3.bf16.msk.msra.mxu1 %vm1344_vm2, %v1341_v6  ;;  %vm58_vm4 = vcmask 23552   ;;  %vm60_vm5 = vcmask 48128  }
   0x9   :  { %167 = vrot.lane.b32.xlu1 %v1330_v2, %s1242_s0  ;;  %55 = vrot.lane.b32.xlu0 %v1330_v2, %s1243_s2  ;;  %s1244_s9 = smov 122   ;;  %s1245_s24 = smov 123   ;;  %vm68_vm6 = vcmask 72704   ;;  %v1015_v45 = vld [vmem:[%s1497_s3] ss:$0 sm:$0xff]  ;;  %vm153_vm7 = vcmask 25600  }
   0xa   :  { %1082 = vmatprep.mubr.msk.f32.mxu1 %vm1240_vm3, %v1241_v8  ;;  %1153 = vmatprep.subr.bf16.mxu1 %v1238_v5  ;;  %s1246_s25 = smov 119   ;;  %s1247_s26 = smov 121   ;;  %v1018_v52 = vld [vmem:[%s1498_s4] ss:$0 sm:$0xff]  ;;  %vm878_vm8 = vcmask 7168   ;;  %vm880_vm9 = vcmask 15360  }
   0xb   :  { %s1248_s27 = smov 118   ;;  %s1249_s28 = smov 120   ;;  %vm883_vm10 = vcmask 31744   ;;  %vm885_vm11 = vcmask 39936   ;;  %vm888_vm12 = vcmask 56320   ;;  %vm890_vm13 = vcmask 64512  }
   0xc   :  { %s1250_s29 = smov 116   ;;  %s1251_s30 = smov 117   ;;  %vm999_vm14 = vcmask 197632  }
   0xd   :  { %253 = vrot.lane.b32.xlu1 %v1330_v2, %s1244_s9  ;;  %170 = vrot.lane.b32.xlu0 %v1330_v2, %s1245_s24  ;;  %s1252_s11 = smov 115   ;;  %s1253_s12 = smov 114  }
   0xe   :  { %s1254_s13 = smov 112   ;;  %s1255_s14 = smov 113  }
   0xf   :  { %s1256_s3 = smov 2   ;;  %s1257_s4 = smov 1  }
  0x10   :  { %s1258_s5 = smov 3   ;;  %s1259_s23 = smov 4  }
  0x11   :  { %339 = vrot.lane.b32.xlu1 %v1330_v2, %s1246_s25  ;;  %336 = vrot.lane.b32.xlu0 %v1330_v2, %s1247_s26  ;;  %s1260_s0 = smov 5   ;;  %s1261_s2 = smov 6  }
  0x12   :  { %s1263_s9 = smov 8  }
  0x15   :  { %425 = vrot.lane.b32.xlu1 %v1330_v2, %s1248_s27  ;;  %422 = vrot.lane.b32.xlu0 %v1330_v2, %s1249_s28 }
  0x19   :  { %591 = vrot.lane.b32.xlu1 %v1330_v2, %s1250_s29  ;;  %508 = vrot.lane.b32.xlu0 %v1330_v2, %s1251_s30 }
  0x1d   :  { %677 = vrot.lane.b32.xlu1 %v1330_v2, %s1252_s11  ;;  %594 = vrot.lane.b32.xlu0 %v1330_v2, %s1253_s12 }
  0x21   :  { %763 = vrot.lane.b32.xlu1 %v1330_v2, %s1254_s13  ;;  %680 = vrot.lane.b32.xlu0 %v1330_v2, %s1255_s14 }
  0x76   :  { %v165_v9 = vpop.permute.xlu1 %164  ;;  %v53_v10 = vpop.permute.xlu0 %52 }
  0x77   :  { %v59_v11 = vsel %vm58_vm4, %v1330_v2, %v53_v10 }
  0x7b   :  { %v168_v12 = vpop.permute.xlu1 %167  ;;  %v56_v13 = vpop.permute.xlu0 %55 }
  0x7c   :  { %v61_v14 = vsel %vm60_vm5, %v59_v11, %v56_v13  ;;  %v173_v15 = vsel %vm58_vm4, %v165_v9, %v168_v12  ;;  %v256_v16 = vsel %vm58_vm4, %v53_v10, %v56_v13 }
  0x7d   :  { %1076 = vmatmul.mubr.msk.f32.vlgmr.msra.gmra.mrb[0].mxu0 %vm68_vm6, %v61_v14 }
  0x7e   :  { %1152 = vmatpush3.bf16.msk.msra.mxu0 %vm1344_vm2, %v1341_v6  ;;  %1089 = vmatprep.mubr.msk.f32.mxu0 %vm1240_vm3, %v1241_v8 }
  0x7f   :  { %v254_v17 = vpop.permute.xlu1 %253  ;;  %v171_v18 = vpop.permute.xlu0 %170  ;;  %1157 = vmatprep.subr.bf16.mxu0 %v1238_v5 }
  0x80   :  { %v257_v19 = vsel %vm60_vm5, %v256_v16, %v254_v17  ;;  %v174_v20 = vsel %vm60_vm5, %v173_v15, %v171_v18 }
  0x81   :  { %1083 = vmatmul.mubr.msk.f32.vlgmr.msra.gmra.mrb[0].mxu1 %vm68_vm6, %v174_v20  ;;  %1090 = vmatmul.mubr.msk.f32.vlgmr.msra.gmra.mrb[2].mxu0 %vm68_vm6, %v257_v19 }
  0x82   :  { %1156 = vmatpush3.bf16.msk.msra.mxu1 %vm1344_vm2, %v1341_v6  ;;  %1096 = vmatprep.mubr.msk.f32.mxu1 %vm1240_vm3, %v1241_v8 }
  0x83   :  { %v340_v21 = vpop.permute.xlu1 %339  ;;  %v337_v22 = vpop.permute.xlu0 %336  ;;  %1160 = vmatpush3.bf16.msk.msra.mxu0 %vm1344_vm2, %v1341_v6  ;;  %1103 = vmatprep.mubr.msk.f32.mxu0 %vm1240_vm3, %v1241_v8 }
  0x84   :  { %v342_v23 = vsel %vm58_vm4, %v171_v18, %v337_v22  ;;  %1161 = vmatprep.subr.bf16.mxu1 %v1238_v5  ;;  %1165 = vmatprep.subr.bf16.mxu0 %v1238_v5  ;;  %v511_v29 = vsel %vm58_vm4, %v337_v22, %v340_v21 }
  0x85   :  { %v343_v24 = vsel %vm60_vm5, %v342_v23, %v340_v21 }
  0x86   :  { %1097 = vmatmul.mubr.msk.f32.vlgmr.msra.gmra.mrb[2].mxu1 %vm68_vm6, %v343_v24 }
  0x87   :  { %v426_v25 = vpop.permute.xlu1 %425  ;;  %v423_v26 = vpop.permute.xlu0 %422  ;;  %1164 = vmatpush3.bf16.msk.msra.mxu1 %vm1344_vm2, %v1341_v6  ;;  %1110 = vmatprep.mubr.msk.f32.mxu1 %vm1240_vm3, %v1241_v8 }
  0x88   :  { %v428_v27 = vsel %vm58_vm4, %v254_v17, %v423_v26  ;;  %1169 = vmatprep.subr.bf16.mxu1 %v1238_v5 }
  0x89   :  { %v429_v28 = vsel %vm60_vm5, %v428_v27, %v426_v25 }
  0x8a   :  { %1104 = vmatmul.mubr.msk.f32.vlgmr.msra.gmra.mrb[4].mxu0 %vm68_vm6, %v429_v28  ;;  %v1019_v28 = vld [vmem:[#allocation2] ss:$0 sm:$0xff] }
  0x8b   :  { %v592_v30 = vpop.permute.xlu1 %591  ;;  %v509_v31 = vpop.permute.xlu0 %508  ;;  %1168 = vmatpush3.bf16.msk.msra.mxu0 %vm1344_vm2, %v1341_v6  ;;  %1117 = vmatprep.mubr.msk.f32.mxu0 %vm1240_vm3, %v1241_v8 }
  0x8c   :  { %v512_v32 = vsel %vm60_vm5, %v511_v29, %v509_v31  ;;  %1173 = vmatprep.subr.bf16.mxu0 %v1238_v5  ;;  %v597_v33 = vsel %vm58_vm4, %v426_v25, %v592_v30 }
  0x8d   :  { %1111 = vmatmul.mubr.msk.f32.vlgmr.msra.gmra.mrb[4].mxu1 %vm68_vm6, %v512_v32 }
  0x8e   :  { %1172 = vmatpush3.bf16.msk.msra.mxu1 %vm1344_vm2, %v1341_v6  ;;  %1124 = vmatprep.mubr.msk.f32.mxu1 %vm1240_vm3, %v1241_v8 }
  0x8f   :  { %v678_v34 = vpop.permute.xlu1 %677  ;;  %v595_v35 = vpop.permute.xlu0 %594  ;;  %1177 = vmatprep.subr.bf16.mxu1 %v1238_v5 }
  0x90   :  { %v598_v36 = vsel %vm60_vm5, %v597_v33, %v595_v35  ;;  %v683_v37 = vsel %vm58_vm4, %v509_v31, %v678_v34  ;;  %v766_v38 = vsel %vm58_vm4, %v592_v30, %v595_v35  ;;  %v46_v35 = vld [vmem:[%s1500_s6] sm:$0xff] }
  0x91   :  { %1118 = vmatmul.mubr.msk.f32.vlgmr.msra.gmra.mrb[6].mxu0 %vm68_vm6, %v598_v36  ;;  %v47_v36 = vld [vmem:[%s1500_s6 + $0x8] sm:$0x1]  ;;  %s1262_s6 = smov 7  }
  0x92   :  { %1176 = vmatpush3.bf16.msk.msra.mxu0 %vm1344_vm2, %v1341_v6  ;;  %1131 = vmatprep.mubr.msk.f32.mxu0 %vm1240_vm3, %v1241_v8 }
  0x93   :  { %v764_v39 = vpop.permute.xlu1 %763  ;;  %v681_v40 = vpop.permute.xlu0 %680 }
  0x94   :  { %v767_v41 = vsel %vm60_vm5, %v766_v38, %v764_v39  ;;  %v684_v42 = vsel %vm60_vm5, %v683_v37, %v681_v40  ;;  %v1178_v37 = vpack.c.bf16 %v47_v36, %v46_v35 }
  0x95   :  { %1125 = vmatmul.mubr.msk.f32.vlgmr.msra.gmra.mrb[6].mxu1 %vm68_vm6, %v684_v42  ;;  %1132 = vmatmul.mubr.msk.f32.vlgmr.msra.gmra.mrb[8].mxu0 %vm68_vm6, %v767_v41 }
  0x96   :  { %1138 = vmatprep.mubr.msk.f32.mxu1 %vm1240_vm3, %v1241_v8  ;;  %1180 = vmatpush3.bf16.msk.msra.mxu1 %vm1344_vm2, %v1178_v37 }
 0x150   :  { %v142_v43 = vpop.f32.mrb[0].mxu0 }
 0x151   :  { %v1077_v44 = vpop.f32.mrb[1].mxu0  ;;  %v143_v16 = vadd.f32 %v1015_v45, %v142_v43 }
 0x153   :  { %v152_v26 = vmul.f32 %v1018_v52, %v143_v16 }
 0x154   :  { %v244_v46 = vpop.f32.mrb[0].mxu1  ;;  %v327_v47 = vpop.f32.mrb[2].mxu0 }
 0x155   :  { %v245_v48 = vadd.f32 %v1015_v45, %v244_v46  ;;  %v328_v49 = vadd.f32 %v1015_v45, %v327_v47  ;;  %v1084_v50 = vpop.f32.mrb[1].mxu1  ;;  %v1091_v51 = vpop.f32.mrb[3].mxu0  ;;  %v154_v27 = vsel %vm153_vm7, %v152_v26, 0.0 }
 0x157   :  { %v331_v53 = vmul.f32 %v1018_v52, %v328_v49  ;;  %v248_v54 = vmul.f32 %v1018_v52, %v245_v48 }
 0x159   :  { %v413_v55 = vpop.f32.mrb[2].mxu1  ;;  %v332_v56 = vsel %vm153_vm7, %v331_v53, 0.0  ;;  %v249_v57 = vsel %vm153_vm7, %v248_v54, 0.0 }
 0x15a   :  { %v414_v58 = vadd.f32 %v1015_v45, %v413_v55  ;;  %333 = vadd.xlane.f32.xlu1 %v332_v56  ;;  %250 = vadd.xlane.f32.xlu0 %v249_v57  ;;  %v1098_v59 = vpop.f32.mrb[3].mxu1 }
 0x15c   :  { %v417_v60 = vmul.f32 %v1018_v52, %v414_v58 }
 0x15d   :  { %v499_v61 = vpop.f32.mrb[4].mxu0 }
 0x15e   :  { %v500_v62 = vadd.f32 %v1015_v45, %v499_v61  ;;  %v1105_v63 = vpop.f32.mrb[5].mxu0  ;;  %v418_v0 = vsel %vm153_vm7, %v417_v60, 0.0 }
 0x15f   :  { %419 = vadd.xlane.f32.xlu0 %v418_v0 }
 0x160   :  { %v582_v1 = vpop.f32.mrb[4].mxu1  ;;  %v503_v3 = vmul.f32 %v1018_v52, %v500_v62 }
 0x161   :  { %v583_v4 = vadd.f32 %v1015_v45, %v582_v1  ;;  %v1112_v5 = vpop.f32.mrb[5].mxu1  ;;  %v1036_v1 = vld [vmem:[%s1501_s7] ss:$0 sm:$0xff]  ;;  %s1265_s7 = smov [#allocation4]  }
 0x162   :  { %v504_v6 = vsel %vm153_vm7, %v503_v3, 0.0  ;;  %s1007_s30 = sshll.u32 %s1265_s7, 4  ;;  %s1008_s30 = int_to_ptr.vmem [resolvable:$true] %s1007_s30 }
 0x163   :  { %505 = vadd.xlane.f32.xlu0 %v504_v6  ;;  %v586_v8 = vmul.f32 %v1018_v52, %v583_v4  ;;  %v974_v4 = vld [vmem:[%s1495_s1] sm:$0x3]  ;;  %s1212_s1 = scalar_lea.vmem %s1008_s30, 32  ;;  %p1217_p1 = scmp.lt.s32.totalorder %s1008_s30, %s1008_s30 }
 0x164   :  { %v668_v9 = vpop.f32.mrb[6].mxu0  ;;  %p1213_p0 = scmp.ne.s32.totalorder %s1008_s30, %s1212_s1  ;;  %p1218_p2 = scmp.lt.s32.totalorder %s1212_s1, %s1212_s1 }
 0x165   :  { %v669_v10 = vadd.f32 %v1015_v45, %v668_v9  ;;  %v1119_v11 = vpop.f32.mrb[7].mxu0  ;;  %v587_v12 = vsel %vm153_vm7, %v586_v8, 0.0  ;;  %v1039_v8 = vld [vmem:[%s1502_s8] ss:$0 sm:$0xff] }
 0x166   :  { %588 = vadd.xlane.f32.xlu1 %v587_v12  ;;  %v1264_v12 = vmov 0   ;;  %p1219_p3 = por %p1218_p2, %p1217_p1 }
 0x167   :  { %v672_v13 = vmul.f32 %v1018_v52, %v669_v10  ;;  %1211 = vset.pattern.permute.xlu0 %v1264_v12 }
 0x168   :  { %v754_v14 = vpop.f32.mrb[6].mxu1  ;;  %v837_v15 = vpop.f32.mrb[8].mxu0  ;;  %p1220_p4 = pnand %p1219_p3, %p1213_p0 }
 0x169   :  { %v755_v17 = vadd.f32 %v1015_v45, %v754_v14  ;;  %v838_v18 = vadd.f32 %v1015_v45, %v837_v15  ;;  %v1126_v19 = vpop.f32.mrb[7].mxu1  ;;  %v1133_v20 = vpop.f32.mrb[9].mxu0  ;;  %v673_v21 = vsel %vm153_vm7, %v672_v13, 0.0  ;;  %v1040_v13 = vld [vmem:[#allocation3] ss:$0 sm:$0xff] }
 0x16a   :  { %674 = vadd.xlane.f32.xlu0 %v673_v21 }
 0x16b   :  { %v841_v22 = vmul.f32 %v1018_v52, %v838_v18  ;;  %v758_v23 = vmul.f32 %v1018_v52, %v755_v17 }
 0x16d   :  { %v842_v24 = vsel %vm153_vm7, %v841_v22, 0.0  ;;  %v759_v25 = vsel %vm153_vm7, %v758_v23, 0.0 }
 0x16e   :  { %843 = vadd.xlane.f32.xlu0 %v842_v24  ;;  %760 = vadd.xlane.f32.xlu1 %v759_v25 }
 0x172   :  { %155 = vadd.xlane.f32.xlu1 %v154_v27 }
 0x1e7   :  { %v334_v29 = vpop.xlane.xlu1 %333  ;;  %v251_v30 = vpop.xlane.xlu0 %250 }
 0x1e8   :  { %v335_v31 = vadd.f32 %v1019_v28, %v334_v29  ;;  %v252_v32 = vadd.f32 %v1019_v28, %v251_v30 }
 0x1ea   :  { %851 = vrot.lane.b32.xlu1 %v335_v31, %s1256_s3  ;;  %847 = vrot.lane.b32.xlu0 %v252_v32, %s1257_s4 }
 0x1ec   :  { %v420_v33 = vpop.xlane.xlu0 %419 }
 0x1ed   :  { %v421_v34 = vadd.f32 %v1019_v28, %v420_v33 }
 0x1ef   :  { %855 = vrot.lane.b32.xlu1 %v421_v34, %s1258_s5 }
 0x1f0   :  { %v506_v38 = vpop.xlane.xlu0 %505 }
 0x1f1   :  { %v507_v39 = vadd.f32 %v1019_v28, %v506_v38 }
 0x1f3   :  { %v589_v40 = vpop.xlane.xlu1 %588  ;;  %859 = vrot.lane.b32.xlu0 %v507_v39, %s1259_s23 }
 0x1f4   :  { %v590_v41 = vadd.f32 %v1019_v28, %v589_v40 }
 0x1f6   :  { %863 = vrot.lane.b32.xlu1 %v590_v41, %s1260_s0 }
 0x1f7   :  { %v675_v42 = vpop.xlane.xlu0 %674 }
 0x1f8   :  { %v676_v43 = vadd.f32 %v1019_v28, %v675_v42 }
 0x1fa   :  { %867 = vrot.lane.b32.xlu0 %v676_v43, %s1261_s2 }
 0x1fb   :  { %v761_v44 = vpop.xlane.xlu1 %760  ;;  %v844_v45 = vpop.xlane.xlu0 %843 }
 0x1fc   :  { %v762_v46 = vadd.f32 %v1019_v28, %v761_v44  ;;  %v845_v47 = vadd.f32 %v1019_v28, %v844_v45 }
 0x1fe   :  { %871 = vrot.lane.b32.xlu1 %v762_v46, %s1262_s6  ;;  %875 = vrot.lane.b32.xlu0 %v845_v47, %s1263_s9 }
 0x1ff   :  { %v156_v7 = vpop.xlane.xlu1 %155 }
 0x200   :  { %v163_v50 = vadd.f32 %v1019_v28, %v156_v7 }
 0x25c   :  { %v852_v48 = vpop.permute.xlu1 %851  ;;  %v848_v49 = vpop.permute.xlu0 %847 }
 0x25d   :  { %v879_v53 = vsel %vm878_vm8, %v163_v50, %v848_v49 }
 0x25e   :  { %v881_v54 = vsel %vm880_vm9, %v879_v53, %v852_v48 }
 0x261   :  { %v856_v51 = vpop.permute.xlu1 %855 }
 0x262   :  { %v882_v57 = vsel %vm58_vm4, %v881_v54, %v856_v51 }
 0x265   :  { %v860_v52 = vpop.permute.xlu0 %859 }
 0x266   :  { %v884_v58 = vsel %vm883_vm10, %v882_v57, %v860_v52 }
 0x268   :  { %v864_v55 = vpop.permute.xlu1 %863 }
 0x269   :  { %v886_v59 = vsel %vm885_vm11, %v884_v58, %v864_v55 }
 0x26c   :  { %v868_v56 = vpop.permute.xlu0 %867 }
 0x26d   :  { %v887_v60 = vsel %vm60_vm5, %v886_v59, %v868_v56 }
 0x270   :  { %v872_v61 = vpop.permute.xlu1 %871  ;;  %v876_v62 = vpop.permute.xlu0 %875 }
 0x271   :  { %v889_v63 = vsel %vm888_vm12, %v887_v60, %v872_v61 }
 0x272   :  { %v891_v0 = vsel %vm890_vm13, %v889_v63, %v876_v62 }
 0x273   :  { %1139 = vmatmul.mubr.msk.f32.vlgmr.msra.gmra.mrb[8].mxu1 %vm68_vm6, %v891_v0 }
 0x346   :  { %v970_v3 = vpop.f32.mrb[8].mxu1 }
 0x347   :  { %v971_v5 = vadd.f32 %v1036_v1, %v970_v3  ;;  %v1140_v6 = vpop.f32.mrb[9].mxu1 }
 0x349   :  { %v975_v9 = vsub.f32 %v974_v4, %v971_v5 }
 0x34b   :  { %v982_v10 = vmul.f32 %v1039_v8, %v975_v9 }
 0x34d   :  { %v983_v11 = vsel %vm153_vm7, %v982_v10, 0.0 }
 0x34e   :  { %984 = vadd.xlane.f32.xlu1 %v983_v11 }
 0x3db   :  { %v985_v14 = vpop.xlane.xlu1 %984 }
 0x3dc   :  { %v992_v15 = vadd.f32 %v1040_v13, %v985_v14 }
 0x3de   :  { %995 = vperm.xlu0 %1211, %v992_v15  }
 0x45d   :  { %v996_v16 = vpop.permute.xlu0 %995 }
 0x45e   :  { %v998_v17 = vadd.f32 %v996_v16, %v1330_v2 }
 0x460   :  { %1000 = vst.msk [vmem:[#allocation4] sm:$0x3] %vm999_vm14, %v998_v17 }
 0x461   :  { %1223 = shalt.err (!%p1220_p4)
}
 0x462   :  { %s1224_s12 = scalar_lea.hbm %s1503_s10, 32 }
 0x463   :  { %p1225_p5 = scmp.ne.s32.totalorder %s1503_s10, %s1224_s12  ;;  %p1228_p6 = scmp.lt.u32.totalorder %s1224_s12, %s1503_s10 }
 0x465   :  { %p1230_p7 = pnand %p1228_p6, %p1225_p5 }
 0x467   :  { %1233 = shalt.err (!%p1230_p7)
}
 0x468   :  { %1010 = dma.vmem_to_hbm [thread:$0]  %s1008_s30, 32, %s1503_s10, [#allocation5]  }
 0x469   :  { %1234 = dma.done.wait [#allocation5], 32  }
 0x46a   :  { %1235 = vsyncadd [#allocation5], 4294967264 }
 0x46b   :  { %1014 = vsyncpa [#allocation5], 1 }

</bundles_post_ra>
